<compile_context>
chip_gen: v7x
topology: tpu7x:2x2x1
jax: 0.10.0
libtpu: 0.0.40
codegen_flags: <defaults>
</compile_context>

<pallas_src>
import jax
import jax.numpy as jnp
from jax.experimental import pallas as pl
from jax.experimental.pallas import tpu as pltpu

CONV_OUT = 4     # GatedGraphConv out_channels
LSTM_OUT = 32    # LSTM hidden size
PACK_W = 128     # lane-dense packed-output width: [h(32) | c(32) | out bcast(64)]


def _round_up(v, m):
    return ((v + m - 1) // m) * m


def _vmem_capacity_bytes():
    """Per-core VMEM capacity; conservative 64 MiB fallback (v7x-sized)."""
    try:
        return int(pltpu.get_tpu_info().vmem_capacity_bytes)
    except Exception:
        return 64 * 1024 * 1024


def _dygre_kernel(xb_ref, x_ref, a_ref, gru_w_ref, lstm_whh_ref, lstm_wih_ref,
                  misc_ref, hc0_ref, out_ref):
    tm = out_ref.shape[0]

    # ---- GatedGraphConv (1 layer, mean aggr); conv weight folded into W_gi ----
    # xb_ref is the pre-cast bf16 resident copy of x (no per-step cast).
    ax = jnp.dot(a_ref[...], xb_ref[...],
                 preferred_element_type=jnp.float32)        # (tm, 4) = (A @ x) row tile
    x_tile = x_ref[...]                                     # (tm, 4) f32 row tile

    # ---- GRUCell(m, x):  gi = (A@x) @ (W_conv @ W_ih^T),  gh = x @ W_hh^T ----
    gi = jnp.dot(ax, gru_w_ref[0], preferred_element_type=jnp.float32) \
        + misc_ref[1][:, 0:3 * CONV_OUT]                    # + b_ih  (1,12)
    gh = jnp.dot(x_tile, gru_w_ref[1], preferred_element_type=jnp.float32) \
        + misc_ref[2][:, 0:3 * CONV_OUT]                    # + b_hh  (1,12)
    r = jax.nn.sigmoid(gi[:, 0:CONV_OUT] + gh[:, 0:CONV_OUT])
    z = jax.nn.sigmoid(gi[:, CONV_OUT:2 * CONV_OUT] + gh[:, CONV_OUT:2 * CONV_OUT])
    n = jnp.tanh(gi[:, 2 * CONV_OUT:3 * CONV_OUT] + r * gh[:, 2 * CONV_OUT:3 * CONV_OUT])
    x_t = (1.0 - z) * n + z * x_tile                        # (tm, 4)

    # ---- LSTM single step: two bf16 dots, no scratch roundtrip ----
    hc = hc0_ref[...]                                       # (tm, 64) f32
    h0 = hc[:, 0:LSTM_OUT]
    c0 = hc[:, LSTM_OUT:2 * LSTM_OUT]
    g = (jnp.dot(h0.astype(jnp.bfloat16), lstm_whh_ref[...],
                 preferred_element_type=jnp.float32)
         + jnp.dot(x_t.astype(jnp.bfloat16), lstm_wih_ref[...],
                   preferred_element_type=jnp.float32)
         + misc_ref[0])                                     # + (b_ih + b_hh)  (1,128)
    i_g = jax.nn.sigmoid(g[:, 0:LSTM_OUT])
    f_g = jax.nn.sigmoid(g[:, LSTM_OUT:2 * LSTM_OUT])
    g_g = jnp.tanh(g[:, 2 * LSTM_OUT:3 * LSTM_OUT])
    o_g = jax.nn.sigmoid(g[:, 3 * LSTM_OUT:4 * LSTM_OUT])
    c = f_g * c0 + i_g * g_g
    h = o_g * jnp.tanh(c)

    # ---- ReLU + Linear(32 -> 1) as a VPU/XLU lane reduction (no MXU push) ----
    lin_w = misc_ref[3][:, 0:LSTM_OUT]                      # (1, 32)
    lin_b = misc_ref[4][:, 0:1]                             # (1, 1)
    y = jnp.sum(jnp.maximum(h, 0.0) * lin_w, axis=-1, keepdims=True) + lin_b  # (tm,1)

    # ---- single lane-dense (tm, 128) output store: [h | c | out broadcast] ----
    out_ref[...] = jnp.concatenate(
        [h, c, jnp.broadcast_to(y, (tm, PACK_W - 2 * LSTM_OUT))], axis=-1)


def init_raw_params(key):
    """Deterministic params with shapes matching the PyTorch module."""
    ks = jax.random.split(key, 10)
    s = 0.1
    return {
        "ggc_w": s * jax.random.normal(ks[0], (CONV_OUT, CONV_OUT), jnp.float32),
        "gru_wih": s * jax.random.normal(ks[1], (3 * CONV_OUT, CONV_OUT), jnp.float32),
        "gru_whh": s * jax.random.normal(ks[2], (3 * CONV_OUT, CONV_OUT), jnp.float32),
        "gru_bih": s * jax.random.normal(ks[3], (3 * CONV_OUT,), jnp.float32),
        "gru_bhh": s * jax.random.normal(ks[4], (3 * CONV_OUT,), jnp.float32),
        "lstm_wih": s * jax.random.normal(ks[5], (4 * LSTM_OUT, CONV_OUT), jnp.float32),
        "lstm_whh": s * jax.random.normal(ks[6], (4 * LSTM_OUT, LSTM_OUT), jnp.float32),
        "lstm_bih": s * jax.random.normal(ks[7], (4 * LSTM_OUT,), jnp.float32),
        "lstm_bhh": s * jax.random.normal(ks[8], (4 * LSTM_OUT,), jnp.float32),
        "lin_w": s * jax.random.normal(ks[9], (1, LSTM_OUT), jnp.float32),
        "lin_b": jnp.zeros((1,), jnp.float32),
    }


def pack_params(raw):
    """Pack/fuse module parameters into the few VMEM operands the kernel needs."""
    wf = raw["ggc_w"] @ raw["gru_wih"].T                    # fused conv+GRU ih: (4, 12)
    whh = raw["gru_whh"].T                                  # (4, 12)
    gru_w = jnp.stack([wf, whh], axis=0)                    # (2, 4, 12) f32 (tiny dots)
    lstm_whh = raw["lstm_whh"].T.astype(jnp.bfloat16)       # (32, 128) bf16
    lstm_wih = raw["lstm_wih"].T.astype(jnp.bfloat16)       # (4, 128)  bf16
    lstm_b = (raw["lstm_bih"] + raw["lstm_bhh"]).astype(jnp.float32)   # (128,)
    misc = jnp.zeros((5, 1, 4 * LSTM_OUT), jnp.float32)
    misc = misc.at[0, 0, :].set(lstm_b)                      # row 0: merged LSTM bias
    misc = misc.at[1, 0, :3 * CONV_OUT].set(raw["gru_bih"])  # row 1: GRU b_ih (kept separate!)
    misc = misc.at[2, 0, :3 * CONV_OUT].set(raw["gru_bhh"])  # row 2: GRU b_hh
    misc = misc.at[3, 0, :LSTM_OUT].set(raw["lin_w"][0])     # row 3: Linear weight row
    misc = misc.at[4, 0, 0].set(raw["lin_b"][0])             # row 4: Linear bias
    return {"gru_w": gru_w, "lstm_whh": lstm_whh, "lstm_wih": lstm_wih, "misc": misc}


def recurrent_gcn_dygre_forward(params, x, edge_index, edge_weight, h_0, c_0):
    """x: (N,F) F<=4; edge_index: (2,E) int32; edge_weight: (E,);
    h_0, c_0: (1,N,32).  Returns (out (N,1), H (N,32), C (N,32))."""
    N, F = x.shape
    assert F <= CONV_OUT

    # Row-tile sizing, gated by the actual chip's VMEM capacity: one tile when
    # small; otherwise TM (multiple of 16) so the double-buffered bf16 A tile
    # fits a generation-appropriate budget (~48 MiB on 128 MiB parts, ~24 MiB
    # on 64 MiB parts).
    N8 = _round_up(max(N, 8), 8)
    cap = _vmem_capacity_bytes()
    if N8 <= 1024:
        TM = N8
    else:
        a_budget = max(16 << 20, min(48 << 20, cap // 2 - (8 << 20)))
        budget_rows = a_budget // (2 * 2 * N8)          # 2 buffers x bf16 bytes
        TM = max(16, min(4096, (budget_rows // 16) * 16))
    N_pad = _round_up(N8, TM)
    num_tiles = N_pad // TM
    a_bytes = 2 * TM * N_pad * 2                        # double-buffered bf16 A tile
    vmem_limit = int(max(32 << 20, min(cap - (8 << 20), a_bytes + (24 << 20))))

    x32 = x.astype(jnp.float32)
    xpad = jnp.zeros((N_pad, CONV_OUT), jnp.float32).at[:N, :F].set(x32)
    xpad_bf16 = xpad.astype(jnp.bfloat16)               # cast ONCE, resident operand

    # Dense normalized aggregation: A[dst, src] = edge_weight, row / in-degree(dst)
    src, dst = edge_index[0], edge_index[1]
    A = jnp.zeros((N_pad, N_pad), jnp.float32).at[dst, src].add(edge_weight.astype(jnp.float32))
    cnt = jnp.zeros((N_pad,), jnp.float32).at[dst].add(1.0)
    A = (A / jnp.maximum(cnt, 1.0)[:, None]).astype(jnp.bfloat16)

    hc0 = jnp.zeros((N_pad, 2 * LSTM_OUT), jnp.float32)
    hc0 = hc0.at[:N, :LSTM_OUT].set(h_0.reshape(N, LSTM_OUT).astype(jnp.float32))
    hc0 = hc0.at[:N, LSTM_OUT:].set(c_0.reshape(N, LSTM_OUT).astype(jnp.float32))

    packed = pl.pallas_call(
        _dygre_kernel,
        out_shape=jax.ShapeDtypeStruct((N_pad, PACK_W), jnp.float32),
        grid=(num_tiles,),
        in_specs=[
            pl.BlockSpec((N_pad, CONV_OUT), lambda i: (0, 0)),               # x bf16 (resident)
            pl.BlockSpec((TM, CONV_OUT), lambda i: (i, 0)),                  # x f32 row tile
            pl.BlockSpec((TM, N_pad), lambda i: (i, 0)),                     # A row tile (bf16)
            pl.BlockSpec((2, CONV_OUT, 3 * CONV_OUT), lambda i: (0, 0, 0)),  # GRU weights
            pl.BlockSpec((LSTM_OUT, 4 * LSTM_OUT), lambda i: (0, 0)),        # LSTM Whh^T bf16
            pl.BlockSpec((CONV_OUT, 4 * LSTM_OUT), lambda i: (0, 0)),        # LSTM Wih^T bf16
            pl.BlockSpec((5, 1, 4 * LSTM_OUT), lambda i: (0, 0, 0)),         # biases + linear
            pl.BlockSpec((TM, 2 * LSTM_OUT), lambda i: (i, 0)),              # [h0 | c0] tile
        ],
        out_specs=pl.BlockSpec((TM, PACK_W), lambda i: (i, 0)),
        compiler_params=pltpu.CompilerParams(
            dimension_semantics=("parallel",),
            vmem_limit_bytes=vmem_limit),
    )(xpad_bf16, xpad, A, params["gru_w"], params["lstm_whh"],
      params["lstm_wih"], params["misc"], hc0)

    H = packed[:N, 0:LSTM_OUT]
    C = packed[:N, LSTM_OUT:2 * LSTM_OUT]
    out = packed[:N, 2 * LSTM_OUT:2 * LSTM_OUT + 1]
    return out, H, C


def _reference_forward(raw, x, edge_index, edge_weight, h_0, c_0):
    """Pure-JAX f32 reference mirroring the PyTorch module (for validation)."""
    N, F = x.shape
    xp = jnp.zeros((N, CONV_OUT), jnp.float32).at[:, :F].set(x.astype(jnp.float32))
    src, dst = edge_index[0], edge_index[1]
    A = jnp.zeros((N, N), jnp.float32).at[dst, src].add(edge_weight.astype(jnp.float32))
    cnt = jnp.zeros((N,), jnp.float32).at[dst].add(1.0)
    A = A / jnp.maximum(cnt, 1.0)[:, None]
    m = A @ (xp @ raw["ggc_w"])
    gi = m @ raw["gru_wih"].T + raw["gru_bih"]
    gh = xp @ raw["gru_whh"].T + raw["gru_bhh"]
    r = jax.nn.sigmoid(gi[:, :CONV_OUT] + gh[:, :CONV_OUT])
    z = jax.nn.sigmoid(gi[:, CONV_OUT:2 * CONV_OUT] + gh[:, CONV_OUT:2 * CONV_OUT])
    n = jnp.tanh(gi[:, 2 * CONV_OUT:] + r * gh[:, 2 * CONV_OUT:])
    xt = (1.0 - z) * n + z * xp
    h0 = h_0.reshape(N, LSTM_OUT)
    c0 = c_0.reshape(N, LSTM_OUT)
    g = xt @ raw["lstm_wih"].T + raw["lstm_bih"] + h0 @ raw["lstm_whh"].T + raw["lstm_bhh"]
    i_g = jax.nn.sigmoid(g[:, :LSTM_OUT])
    f_g = jax.nn.sigmoid(g[:, LSTM_OUT:2 * LSTM_OUT])
    g_g = jnp.tanh(g[:, 2 * LSTM_OUT:3 * LSTM_OUT])
    o_g = jax.nn.sigmoid(g[:, 3 * LSTM_OUT:])
    c = f_g * c0 + i_g * g_g
    h = o_g * jnp.tanh(c)
    out = jnp.maximum(h, 0.0) @ raw["lin_w"].T + raw["lin_b"]
    return out, h, c


if __name__ == "__main__":
    key = jax.random.PRNGKey(0)
    k_param, k_x, k_ei, k_ew, k_h, k_c = jax.random.split(key, 6)

    N, F, E = 16, 4, 48
    raw = init_raw_params(k_param)
    params = pack_params(raw)

    x = jax.random.normal(k_x, (N, F), jnp.float32)
    edge_index = jax.random.randint(k_ei, (2, E), 0, N, dtype=jnp.int32)
    edge_weight = jax.random.uniform(k_ew, (E,), jnp.float32)
    h_0 = jax.random.normal(k_h, (1, N, LSTM_OUT), jnp.float32)
    c_0 = jax.random.normal(k_c, (1, N, LSTM_OUT), jnp.float32)

    fwd = jax.jit(lambda xx, ei, ew, h0, c0:
                  recurrent_gcn_dygre_forward(params, xx, ei, ew, h0, c0))
    out, H, C = fwd(x, edge_index, edge_weight, h_0, c_0)
    jax.block_until_ready((out, H, C))
    assert out.shape == (N, 1) and H.shape == (N, LSTM_OUT) and C.shape == (N, LSTM_OUT)

    # Validate against the f32 pure-JAX reference (kernel uses bf16 for A and
    # the LSTM gate matmuls only).
    out_r, H_r, C_r = _reference_forward(raw, x, edge_index, edge_weight, h_0, c_0)
    err = max(float(jnp.max(jnp.abs(out - out_r))),
              float(jnp.max(jnp.abs(H - H_r))),
              float(jnp.max(jnp.abs(C - C_r))))
    assert err < 5e-2, f"max abs error vs reference: {err}"

    print("KERNEL_OK")
</pallas_src>

<mosaic_0001>
module attributes {stable_mosaic.version = 11 : i64} {
  func.func private @main(%arg0: i32) attributes {dimension_semantics = [#tpu.dimension_semantics<core_parallel>], iteration_bounds = array<i64: 2>, tpu.core_type = #tpu.core_type<sc_scalar_subcore>, window_params = []} {
    return
  }
}

module attributes {stable_mosaic.version = 11 : i64} {
  func.func private @main(%arg0: i32) attributes {dimension_semantics = [#tpu.dimension_semantics<core_parallel>], iteration_bounds = array<i64: 2>, tpu.core_type = #tpu.core_type<sc_scalar_subcore>, window_params = []} {
    return
  }
}

module attributes {stable_mosaic.version = 11 : i64} {
  func.func @_dygre_kernel(%arg0: i32, %arg1: memref<16x4xbf16, #tpu.memory_space<vmem>>, %arg2: memref<16x4xf32, #tpu.memory_space<vmem>>, %arg3: memref<16x16xbf16, #tpu.memory_space<vmem>>, %arg4: memref<2x4x12xf32, #tpu.memory_space<vmem>>, %arg5: memref<32x128xbf16, #tpu.memory_space<vmem>>, %arg6: memref<4x128xbf16, #tpu.memory_space<vmem>>, %arg7: memref<5x1x128xf32, #tpu.memory_space<vmem>>, %arg8: memref<16x64xf32, #tpu.memory_space<vmem>>, %arg9: memref<16x128xf32, #tpu.memory_space<vmem>>) attributes {dimension_semantics = [#tpu.dimension_semantics<parallel>], iteration_bounds = array<i64: 1>, scalar_prefetch = 0 : i64, scratch_operands = 0 : i64, tpu.core_type = #tpu.core_type<tc>, window_params = [{pipeline_mode = #tpu.pipeline_mode<synchronous>, transform_indices = @transform_0, window_bounds = array<i64: 16, 4>}, {transform_indices = @transform_1, window_bounds = array<i64: 16, 4>}, {transform_indices = @transform_2, window_bounds = array<i64: 16, 16>}, {pipeline_mode = #tpu.pipeline_mode<synchronous>, transform_indices = @transform_3, window_bounds = array<i64: 2, 4, 12>}, {pipeline_mode = #tpu.pipeline_mode<synchronous>, transform_indices = @transform_4, window_bounds = array<i64: 32, 128>}, {pipeline_mode = #tpu.pipeline_mode<synchronous>, transform_indices = @transform_5, window_bounds = array<i64: 4, 128>}, {pipeline_mode = #tpu.pipeline_mode<synchronous>, transform_indices = @transform_6, window_bounds = array<i64: 5, 1, 128>}, {transform_indices = @transform_7, window_bounds = array<i64: 16, 64>}, {transform_indices = @transform_8, window_bounds = array<i64: 16, 128>}]} {
    %c0 = arith.constant 0 : index
    %c0_0 = arith.constant 0 : index
    %0 = vector.load %arg3[%c0, %c0_0] : memref<16x16xbf16, #tpu.memory_space<vmem>>, vector<16x16xbf16>
    %c0_1 = arith.constant 0 : index
    %c0_2 = arith.constant 0 : index
    %1 = vector.load %arg1[%c0_1, %c0_2] : memref<16x4xbf16, #tpu.memory_space<vmem>>, vector<16x4xbf16>
    %cst = arith.constant dense<0.000000e+00> : vector<16x4xf32>
    %2 = tpu.matmul %0, %1, %cst {dimension_numbers = #tpu.dot_dimension_numbers<[1], [0], [0], [1], [0, 0, 1, 1], [], []>} : vector<16x16xbf16>, vector<16x4xbf16>, vector<16x4xf32> -> vector<16x4xf32>
    %c0_3 = arith.constant 0 : index
    %c0_4 = arith.constant 0 : index
    %3 = vector.load %arg2[%c0_3, %c0_4] : memref<16x4xf32, #tpu.memory_space<vmem>>, vector<16x4xf32>
    %c0_5 = arith.constant 0 : index
    %c0_6 = arith.constant 0 : index
    %c0_7 = arith.constant 0 : index
    %4 = vector.load %arg4[%c0_5, %c0_6, %c0_7] : memref<2x4x12xf32, #tpu.memory_space<vmem>>, vector<1x4x12xf32>
    %5 = vector.shape_cast %4 : vector<1x4x12xf32> to vector<4x12xf32>
    %cst_8 = arith.constant dense<0.000000e+00> : vector<16x12xf32>
    %6 = tpu.matmul %2, %5, %cst_8 {dimension_numbers = #tpu.dot_dimension_numbers<[1], [0], [0], [1], [0, 0, 1, 1], [], []>} : vector<16x4xf32>, vector<4x12xf32>, vector<16x12xf32> -> vector<16x12xf32>
    %c1 = arith.constant 1 : index
    %c0_9 = arith.constant 0 : index
    %c0_10 = arith.constant 0 : index
    %7 = vector.load %arg7[%c1, %c0_9, %c0_10] : memref<5x1x128xf32, #tpu.memory_space<vmem>>, vector<1x1x128xf32>
    %8 = vector.shape_cast %7 : vector<1x1x128xf32> to vector<1x128xf32>
    %9 = vector.extract_strided_slice %8 {offsets = [0, 0], sizes = [1, 12], strides = [1, 1]} : vector<1x128xf32> to vector<1x12xf32>
    %10 = vector.broadcast %9 : vector<1x12xf32> to vector<16x12xf32>
    %11 = arith.addf %6, %10 : vector<16x12xf32>
    %c1_11 = arith.constant 1 : index
    %c0_12 = arith.constant 0 : index
    %c0_13 = arith.constant 0 : index
    %12 = vector.load %arg4[%c1_11, %c0_12, %c0_13] : memref<2x4x12xf32, #tpu.memory_space<vmem>>, vector<1x4x12xf32>
    %13 = vector.shape_cast %12 : vector<1x4x12xf32> to vector<4x12xf32>
    %cst_14 = arith.constant dense<0.000000e+00> : vector<16x12xf32>
    %14 = tpu.matmul %3, %13, %cst_14 {dimension_numbers = #tpu.dot_dimension_numbers<[1], [0], [0], [1], [0, 0, 1, 1], [], []>} : vector<16x4xf32>, vector<4x12xf32>, vector<16x12xf32> -> vector<16x12xf32>
    %c2 = arith.constant 2 : index
    %c0_15 = arith.constant 0 : index
    %c0_16 = arith.constant 0 : index
    %15 = vector.load %arg7[%c2, %c0_15, %c0_16] : memref<5x1x128xf32, #tpu.memory_space<vmem>>, vector<1x1x128xf32>
    %16 = vector.shape_cast %15 : vector<1x1x128xf32> to vector<1x128xf32>
    %17 = vector.extract_strided_slice %16 {offsets = [0, 0], sizes = [1, 12], strides = [1, 1]} : vector<1x128xf32> to vector<1x12xf32>
    %18 = vector.broadcast %17 : vector<1x12xf32> to vector<16x12xf32>
    %19 = arith.addf %14, %18 : vector<16x12xf32>
    %20 = vector.extract_strided_slice %11 {offsets = [0, 0], sizes = [16, 4], strides = [1, 1]} : vector<16x12xf32> to vector<16x4xf32>
    %21 = vector.extract_strided_slice %19 {offsets = [0, 0], sizes = [16, 4], strides = [1, 1]} : vector<16x12xf32> to vector<16x4xf32>
    %22 = arith.addf %20, %21 : vector<16x4xf32>
    %23 = arith.negf %22 : vector<16x4xf32>
    %24 = math.exp %23 : vector<16x4xf32>
    %cst_17 = arith.constant 1.000000e+00 : f32
    %25 = vector.broadcast %cst_17 : f32 to vector<16x4xf32>
    %26 = arith.addf %25, %24 : vector<16x4xf32>
    %27 = arith.divf %25, %26 : vector<16x4xf32>
    %28 = vector.extract_strided_slice %11 {offsets = [0, 4], sizes = [16, 4], strides = [1, 1]} : vector<16x12xf32> to vector<16x4xf32>
    %29 = vector.extract_strided_slice %19 {offsets = [0, 4], sizes = [16, 4], strides = [1, 1]} : vector<16x12xf32> to vector<16x4xf32>
    %30 = arith.addf %28, %29 : vector<16x4xf32>
    %31 = arith.negf %30 : vector<16x4xf32>
    %32 = math.exp %31 : vector<16x4xf32>
    %cst_18 = arith.constant 1.000000e+00 : f32
    %33 = vector.broadcast %cst_18 : f32 to vector<16x4xf32>
    %34 = arith.addf %33, %32 : vector<16x4xf32>
    %35 = arith.divf %33, %34 : vector<16x4xf32>
    %36 = vector.extract_strided_slice %11 {offsets = [0, 8], sizes = [16, 4], strides = [1, 1]} : vector<16x12xf32> to vector<16x4xf32>
    %37 = vector.extract_strided_slice %19 {offsets = [0, 8], sizes = [16, 4], strides = [1, 1]} : vector<16x12xf32> to vector<16x4xf32>
    %38 = arith.mulf %27, %37 : vector<16x4xf32>
    %39 = arith.addf %36, %38 : vector<16x4xf32>
    %40 = math.tanh %39 : vector<16x4xf32>
    %cst_19 = arith.constant 1.000000e+00 : f32
    %41 = vector.broadcast %cst_19 : f32 to vector<16x4xf32>
    %42 = arith.subf %41, %35 : vector<16x4xf32>
    %43 = arith.mulf %42, %40 : vector<16x4xf32>
    %44 = arith.mulf %35, %3 : vector<16x4xf32>
    %45 = arith.addf %43, %44 : vector<16x4xf32>
    %c0_20 = arith.constant 0 : index
    %c0_21 = arith.constant 0 : index
    %46 = vector.load %arg8[%c0_20, %c0_21] : memref<16x64xf32, #tpu.memory_space<vmem>>, vector<16x64xf32>
    %47 = vector.extract_strided_slice %46 {offsets = [0, 0], sizes = [16, 32], strides = [1, 1]} : vector<16x64xf32> to vector<16x32xf32>
    %48 = vector.extract_strided_slice %46 {offsets = [0, 32], sizes = [16, 32], strides = [1, 1]} : vector<16x64xf32> to vector<16x32xf32>
    %49 = arith.truncf %47 : vector<16x32xf32> to vector<16x32xbf16>
    %c0_22 = arith.constant 0 : index
    %c0_23 = arith.constant 0 : index
    %50 = vector.load %arg5[%c0_22, %c0_23] : memref<32x128xbf16, #tpu.memory_space<vmem>>, vector<32x128xbf16>
    %cst_24 = arith.constant dense<0.000000e+00> : vector<16x128xf32>
    %51 = tpu.matmul %49, %50, %cst_24 {dimension_numbers = #tpu.dot_dimension_numbers<[1], [0], [0], [1], [0, 0, 1, 1], [], []>} : vector<16x32xbf16>, vector<32x128xbf16>, vector<16x128xf32> -> vector<16x128xf32>
    %52 = arith.truncf %45 : vector<16x4xf32> to vector<16x4xbf16>
    %c0_25 = arith.constant 0 : index
    %c0_26 = arith.constant 0 : index
    %53 = vector.load %arg6[%c0_25, %c0_26] : memref<4x128xbf16, #tpu.memory_space<vmem>>, vector<4x128xbf16>
    %cst_27 = arith.constant dense<0.000000e+00> : vector<16x128xf32>
    %54 = tpu.matmul %52, %53, %cst_27 {dimension_numbers = #tpu.dot_dimension_numbers<[1], [0], [0], [1], [0, 0, 1, 1], [], []>} : vector<16x4xbf16>, vector<4x128xbf16>, vector<16x128xf32> -> vector<16x128xf32>
    %55 = arith.addf %51, %54 : vector<16x128xf32>
    %c0_28 = arith.constant 0 : index
    %c0_29 = arith.constant 0 : index
    %c0_30 = arith.constant 0 : index
    %56 = vector.load %arg7[%c0_28, %c0_29, %c0_30] : memref<5x1x128xf32, #tpu.memory_space<vmem>>, vector<1x1x128xf32>
    %57 = vector.shape_cast %56 : vector<1x1x128xf32> to vector<1x128xf32>
    %58 = vector.broadcast %57 : vector<1x128xf32> to vector<16x128xf32>
    %59 = arith.addf %55, %58 : vector<16x128xf32>
    %60 = vector.extract_strided_slice %59 {offsets = [0, 0], sizes = [16, 32], strides = [1, 1]} : vector<16x128xf32> to vector<16x32xf32>
    %61 = arith.negf %60 : vector<16x32xf32>
    %62 = math.exp %61 : vector<16x32xf32>
    %cst_31 = arith.constant 1.000000e+00 : f32
    %63 = vector.broadcast %cst_31 : f32 to vector<16x32xf32>
    %64 = arith.addf %63, %62 : vector<16x32xf32>
    %65 = arith.divf %63, %64 : vector<16x32xf32>
    %66 = vector.extract_strided_slice %59 {offsets = [0, 32], sizes = [16, 32], strides = [1, 1]} : vector<16x128xf32> to vector<16x32xf32>
    %67 = arith.negf %66 : vector<16x32xf32>
    %68 = math.exp %67 : vector<16x32xf32>
    %cst_32 = arith.constant 1.000000e+00 : f32
    %69 = vector.broadcast %cst_32 : f32 to vector<16x32xf32>
    %70 = arith.addf %69, %68 : vector<16x32xf32>
    %71 = arith.divf %69, %70 : vector<16x32xf32>
    %72 = vector.extract_strided_slice %59 {offsets = [0, 64], sizes = [16, 32], strides = [1, 1]} : vector<16x128xf32> to vector<16x32xf32>
    %73 = math.tanh %72 : vector<16x32xf32>
    %74 = vector.extract_strided_slice %59 {offsets = [0, 96], sizes = [16, 32], strides = [1, 1]} : vector<16x128xf32> to vector<16x32xf32>
    %75 = arith.negf %74 : vector<16x32xf32>
    %76 = math.exp %75 : vector<16x32xf32>
    %cst_33 = arith.constant 1.000000e+00 : f32
    %77 = vector.broadcast %cst_33 : f32 to vector<16x32xf32>
    %78 = arith.addf %77, %76 : vector<16x32xf32>
    %79 = arith.divf %77, %78 : vector<16x32xf32>
    %80 = arith.mulf %71, %48 : vector<16x32xf32>
    %81 = arith.mulf %65, %73 : vector<16x32xf32>
    %82 = arith.addf %80, %81 : vector<16x32xf32>
    %83 = math.tanh %82 : vector<16x32xf32>
    %84 = arith.mulf %79, %83 : vector<16x32xf32>
    %c3 = arith.constant 3 : index
    %c0_34 = arith.constant 0 : index
    %c0_35 = arith.constant 0 : index
    %85 = vector.load %arg7[%c3, %c0_34, %c0_35] : memref<5x1x128xf32, #tpu.memory_space<vmem>>, vector<1x1x128xf32>
    %86 = vector.shape_cast %85 : vector<1x1x128xf32> to vector<1x128xf32>
    %87 = vector.extract_strided_slice %86 {offsets = [0, 0], sizes = [1, 32], strides = [1, 1]} : vector<1x128xf32> to vector<1x32xf32>
    %c4 = arith.constant 4 : index
    %c0_36 = arith.constant 0 : index
    %c0_37 = arith.constant 0 : index
    %88 = vector.load %arg7[%c4, %c0_36, %c0_37] : memref<5x1x128xf32, #tpu.memory_space<vmem>>, vector<1x1x128xf32>
    %89 = vector.shape_cast %88 : vector<1x1x128xf32> to vector<1x128xf32>
    %90 = vector.extract_strided_slice %89 {offsets = [0, 0], sizes = [1, 1], strides = [1, 1]} : vector<1x128xf32> to vector<1x1xf32>
    %cst_38 = arith.constant 0.000000e+00 : f32
    %91 = vector.broadcast %cst_38 : f32 to vector<16x32xf32>
    %92 = arith.maximumf %84, %91 : vector<16x32xf32>
    %93 = vector.broadcast %87 : vector<1x32xf32> to vector<16x32xf32>
    %94 = arith.mulf %92, %93 : vector<16x32xf32>
    %cst_39 = arith.constant dense<0.000000e+00> : vector<16xf32>
    %95 = vector.multi_reduction <add>, %94, %cst_39 [1] : vector<16x32xf32> to vector<16xf32>
    %96 = vector.shape_cast %95 : vector<16xf32> to vector<16x1xf32>
    %97 = vector.broadcast %90 : vector<1x1xf32> to vector<16x1xf32>
    %98 = arith.addf %96, %97 : vector<16x1xf32>
    %99 = vector.shape_cast %98 : vector<16x1xf32> to vector<16x1xf32>
    %100 = vector.broadcast %99 : vector<16x1xf32> to vector<16x64xf32>
    %101 = tpu.concatenate %84, %82, %100 in 1 : vector<16x32xf32>, vector<16x32xf32>, vector<16x64xf32> -> vector<16x128xf32>
    %c0_40 = arith.constant 0 : index
    %c0_41 = arith.constant 0 : index
    %102 = vector.load %arg9[%c0_40, %c0_41] : memref<16x128xf32, #tpu.memory_space<vmem>>, vector<16x128xf32>
    tpu.vector_store %arg9[%c0_40, %c0_41], %101 {strides = array<i32>} : memref<16x128xf32, #tpu.memory_space<vmem>>, vector<16x128xf32>,
    return
  }
  func.func @transform_0(%arg0: i32) -> (i32, i32) {
    %c0_i32 = arith.constant 0 : i32
    %c0_i32_0 = arith.constant 0 : i32
    %c0_i32_1 = arith.constant 0 : i32
    return %c0_i32, %c0_i32_0 : i32, i32
  }
  func.func @transform_1(%arg0: i32) -> (i32, i32) {
    %c0_i32 = arith.constant 0 : i32
    %c0_i32_0 = arith.constant 0 : i32
    return %arg0, %c0_i32 : i32, i32
  }
  func.func @transform_2(%arg0: i32) -> (i32, i32) {
    %c0_i32 = arith.constant 0 : i32
    %c0_i32_0 = arith.constant 0 : i32
    return %arg0, %c0_i32 : i32, i32
  }
  func.func @transform_3(%arg0: i32) -> (i32, i32, i32) {
    %c0_i32 = arith.constant 0 : i32
    %c0_i32_0 = arith.constant 0 : i32
    %c0_i32_1 = arith.constant 0 : i32
    %c0_i32_2 = arith.constant 0 : i32
    return %c0_i32, %c0_i32_0, %c0_i32_1 : i32, i32, i32
  }
  func.func @transform_4(%arg0: i32) -> (i32, i32) {
    %c0_i32 = arith.constant 0 : i32
    %c0_i32_0 = arith.constant 0 : i32
    %c0_i32_1 = arith.constant 0 : i32
    return %c0_i32, %c0_i32_0 : i32, i32
  }
  func.func @transform_5(%arg0: i32) -> (i32, i32) {
    %c0_i32 = arith.constant 0 : i32
    %c0_i32_0 = arith.constant 0 : i32
    %c0_i32_1 = arith.constant 0 : i32
    return %c0_i32, %c0_i32_0 : i32, i32
  }
  func.func @transform_6(%arg0: i32) -> (i32, i32, i32) {
    %c0_i32 = arith.constant 0 : i32
    %c0_i32_0 = arith.constant 0 : i32
    %c0_i32_1 = arith.constant 0 : i32
    %c0_i32_2 = arith.constant 0 : i32
    return %c0_i32, %c0_i32_0, %c0_i32_1 : i32, i32, i32
  }
  func.func @transform_7(%arg0: i32) -> (i32, i32) {
    %c0_i32 = arith.constant 0 : i32
    %c0_i32_0 = arith.constant 0 : i32
    return %arg0, %c0_i32 : i32, i32
  }
  func.func @transform_8(%arg0: i32) -> (i32, i32) {
    %c0_i32 = arith.constant 0 : i32
    %c0_i32_0 = arith.constant 0 : i32
    return %arg0, %c0_i32 : i32, i32
  }
}

</mosaic_0001>

<bundles_post_ra>
// kernel: _lambda_.1
= control target key start
LH: loop header
LB: loop body
LE: loop exit
PB: predicated region body
PF: predicated region fallthrough
CT: control target
= control target key end

     0   :  { %v694_v0 = vmov 0.0   ;;  %vm695_vm0 = vmmov 0   ;;  %vm45_vm1 = vcmask 130048   ;;  %vm108_vm2 = vcmask 1043456   ;;  %s697_s18 = smov 8   ;;  %s698_s19 = smov 124   ;;  %s848_s0 = inlined_call_operand.vmem [shape: bf16[16,4], index: 0, kind: input, shape index: {}]   ;;  %s849_s2 = inlined_call_operand.vmem [shape: bf16[16,16], index: 2, kind: input, shape index: {}]   ;;  %s850_s3 = inlined_call_operand.vmem [shape: f32[2,4,12], index: 3, kind: input, shape index: {}]   ;;  %s851_s1 = inlined_call_operand.vmem [shape: f32[16,4], index: 1, kind: input, shape index: {}]   ;;  %s852_s6 = inlined_call_operand.vmem [shape: f32[5,1,128], index: 6, kind: input, shape index: {}]   ;;  %s853_s4 = inlined_call_operand.vmem [shape: bf16[32,128], index: 4, kind: input, shape index: {}]   ;;  %s854_s5 = inlined_call_operand.vmem [shape: bf16[4,128], index: 5, kind: input, shape index: {}]   ;;  %s855_s7 = inlined_call_operand.vmem [shape: f32[16,64], index: 7, kind: input, shape index: {}]   ;;  %s856_s8 = inlined_call_operand.vmem [shape: f32[16,128], index: 8, kind: output, shape index: {}]  }
   0x1   :  { %620 = vmatprep.subr.bf16.mxu0 %v694_v0  ;;  %v662_v1 = vld [vmem:[%s848_s0] sm:$0xff]   ;;  %622 = vmatprep.mubr.msk.bf16.mxu0 %vm695_vm0, %v694_v0  ;;  %vm101_vm3 = vcmask 31744   ;;  %v775_v10 = vld [vmem:[%s851_s1 + $0x8] sm:$0xff]  ;;  %vm354_vm4 = vcmask 1041408   ;;  %s699_s22 = smov 4   ;;  %vm411_vm5 = vcmask 261120  }
   0x2   :  { %v663_v2 = vld [vmem:[%s849_s2] sm:$0xff]   ;;  %621 = vmatpush3.bf16.msra.mxu0 %v662_v1  ;;  %v665_v43 = vld [vmem:[%s853_s4 + $0x8] sm:$0xff]   ;;  %s701_s9 = smov 32   ;;  %s702_s11 = smov 96   ;;  %vm571_vm6 = vcmask 523264  }
   0x3   :  { %642 = vmatprep.subr.bf16.mxu0 %v694_v0  ;;  %v92_v3 = vld [vmem:[%s850_s3] sm:$0xf]  ;;  %v588_v4 = vld [vmem:[%s850_s3 + $0x4] sm:$0xf]  ;;  %v808_v46 = vld [vmem:[%s855_s7 + $0x8] sm:$0xff] }
   0x4   :  { %626 = vmatprep.subr.msk.mxu1 %vm108_vm2, %v92_v3  ;;  %v90_v7 = vld [vmem:[%s851_s1] sm:$0xff]  ;;  %s696_s1 = smov 120  }
   0x5   :  { %623 = vmatmul.mubr.msk.bf16.vlgmr.msra.gmra.mrb[0].mxu0 %vm45_vm1, %v663_v2  ;;  %627 = vmatpush3.msk.msra.mxu1 %vm108_vm2, %v92_v3  ;;  %v590_v13 = vld [vmem:[%s852_s6 + $0x2] ss:$0 sm:$0xff]  ;;  %v584_v18 = vld [vmem:[%s852_s6 + $0x1] ss:$0 sm:$0xff]  ;;  %v600_v3 = vld [vmem:[%s852_s6] ss:$0 sm:$0xff] }
   0x6   :  { %646 = vmatprep.mubr.msk.bf16.mxu0 %vm695_vm0, %v694_v0  ;;  %631 = vmatprep.subr.msk.mxu1 %vm108_vm2, %v588_v4  ;;  %v664_v40 = vld [vmem:[%s853_s4] sm:$0xff]  }
   0x7   :  { %v347_v42 = vld [vmem:[%s854_s5] sm:$0x3]  ;;  %643 = vmatpush3.bf16.msra.mxu0 %v664_v40 }
   0x8   :  { %v356_v44 = vsel %vm354_vm4, %v347_v42, 0  ;;  %v803_v45 = vld [vmem:[%s855_s7] sm:$0xff]  ;;  %644 = vmatprep.subr.bf16.mxu0 %v694_v0  ;;  %s700_s7 = smov 64  }
   0x9   :  { %v341_v47 = vpack.c.bf16 %v808_v46, %v803_v45 }
   0xb   :  { %645 = vmatpush3.bf16.msra.mxu0 %v665_v43 }
   0xe   :  { %647 = vmatmul.mubr.msk.bf16.vlgmr.msra.gmra.mrb[4].mxu0 %vm411_vm5, %v341_v47  ;;  %v703_v47 = vmov 0  }
   0xf   :  { %660 = vset.pattern.permute.xlu0 %v703_v47  ;;  %661 = vset.pattern.permute.xlu1 %v703_v47 }
  0xd8   :  { %v83_v5 = vpop.f32.mrb[0].mxu0 }
  0xd9   :  { %v624_v6 = vpop.f32.mrb[1].mxu0  ;;  %628 = vmatprep.mubr.msk.f32.mxu1 %vm101_vm3, %v83_v5 }
  0xda   :  { %v86_v8 = vpop.f32.mrb[2].mxu0 }
  0xdb   :  { %v625_v9 = vpop.f32.mrb[3].mxu0  ;;  %629 = vmatmul.mubr.msk.f32.vlgmr.msra.gmra.mrb[0].mxu1 %vm101_vm3, %v86_v8 }
  0xdc   :  { %632 = vmatpush3.msk.msra.mxu1 %vm108_vm2, %v588_v4  ;;  %633 = vmatprep.mubr.msk.f32.mxu1 %vm101_vm3, %v90_v7 }
  0xdd   :  { %636 = vmatprep.subr.bf16.mxu1 %v694_v0 }
  0xdf   :  { %634 = vmatmul.mubr.msk.f32.vlgmr.msra.gmra.mrb[2].mxu1 %vm101_vm3, %v775_v10 }
  0xe0   :  { %638 = vmatprep.mubr.msk.bf16.mxu1 %vm695_vm0, %v694_v0  ;;  %637 = vmatpush3.bf16.msra.mxu1 %v356_v44 }
  0xe1   :  { %v449_v61 = vpop.f32.mrb[4].mxu0 }
  0xe2   :  { %v648_v62 = vpop.f32.mrb[5].mxu0 }
  0xe3   :  { %v452_v63 = vpop.f32.mrb[6].mxu0 }
  0xe4   :  { %v649_v0 = vpop.f32.mrb[7].mxu0 }
 0x1ae   :  { %v630_v11 = vpop.f32.mrb[0].mxu1 }
 0x1af   :  { %v178_v12 = vpop.f32.mrb[1].mxu1  ;;  %v184_v21 = vadd.f32 %v630_v11, %v584_v18 }
 0x1b0   :  { %v179_v19 = vadd.f32 %v584_v18, %v178_v12 }
 0x1b2   :  { %v635_v14 = vpop.f32.mrb[2].mxu1 }
 0x1b3   :  { %v272_v15 = vpop.f32.mrb[3].mxu1  ;;  %v278_v17 = vadd.f32 %v635_v14, %v590_v13 }
 0x1b4   :  { %v273_v16 = vadd.f32 %v590_v13, %v272_v15 }
 0x1b5   :  { %v282_v22 = vadd.f32 %v278_v17, %v184_v21 }
 0x1b6   :  { %297 = vrot.lane.b32.xlu0 %v273_v16, %s696_s1  ;;  %v281_v20 = vadd.f32 %v273_v16, %v179_v19 }
 0x1b7   :  { %v595_v24 = vmul.f32 -1.442695, %v282_v22 }
 0x1b8   :  { %v594_v23 = vmul.f32 -1.442695, %v281_v20 }
 0x1ba   :  { %299 = vrot.lane.b32.xlu0 %v278_v17, %s696_s1  ;;  %666 = vpow2.f32 %v594_v23 }
 0x1bb   :  { %668 = vpow2.f32 %v595_v24 }
 0x1c4   :  { %v667_v25 = vpop.eup %666 }
 0x1c5   :  { %v289_v26 = vadd.f32 1.0, %v667_v25  ;;  %v669_v27 = vpop.eup %668 }
 0x1c6   :  { %v290_v28 = vadd.f32 1.0, %v669_v27 }
 0x1c7   :  { %670 = vrcp.f32 %v289_v26 }
 0x1c8   :  { %672 = vrcp.f32 %v290_v28 }
 0x1d1   :  { %v671_v29 = vpop.eup %670 }
 0x1d2   :  { %v673_v32 = vpop.eup %672  ;;  %v317_v51 = vsub.f32 1.0, %v671_v29 }
 0x1d3   :  { %v318_v53 = vsub.f32 1.0, %v673_v32 }
 0x228   :  { %v298_v30 = vpop.permute.xlu0 %297 }
 0x229   :  { %v303_v31 = vmul.f32 %v671_v29, %v298_v30 }
 0x22b   :  { %307 = vrot.lane.b32.xlu1 %v303_v31, %s697_s18 }
 0x22c   :  { %v300_v33 = vpop.permute.xlu0 %299 }
 0x22d   :  { %v304_v34 = vmul.f32 %v673_v32, %v300_v33 }
 0x22f   :  { %309 = vrot.lane.b32.xlu1 %v304_v34, %s697_s18 }
 0x29d   :  { %v308_v35 = vpop.permute.xlu1 %307 }
 0x29e   :  { %v313_v36 = vadd.f32 %v308_v35, %v179_v19 }
 0x2a0   :  { %674 = vtanh.f32 %v313_v36 }
 0x2a1   :  { %v310_v37 = vpop.permute.xlu1 %309 }
 0x2a2   :  { %v314_v38 = vadd.f32 %v310_v37, %v184_v21 }
 0x2a4   :  { %676 = vtanh.f32 %v314_v38 }
 0x2aa   :  { %v675_v39 = vpop.eup %674 }
 0x2ab   :  { %321 = vrot.lane.b32.xlu0 %v675_v39, %s698_s19 }
 0x2ae   :  { %v677_v41 = vpop.eup %676 }
 0x2af   :  { %329 = vrot.lane.b32.xlu0 %v90_v7, %s699_s22  ;;  %323 = vrot.lane.b32.xlu1 %v677_v41, %s698_s19 }
 0x2b3   :  { %331 = vrot.lane.b32.xlu1 %v775_v10, %s699_s22 }
 0x31d   :  { %v322_v48 = vpop.permute.xlu0 %321 }
 0x31e   :  { %v327_v55 = vmul.f32 %v322_v48, %v317_v51  ;;  %v606_v48 = vld [vmem:[%s852_s6 + $0x4] ss:$0 sm:$0xff] }
 0x321   :  { %v330_v49 = vpop.permute.xlu0 %329  ;;  %v324_v50 = vpop.permute.xlu1 %323 }
 0x322   :  { %v335_v52 = vmul.f32 %v671_v29, %v330_v49  ;;  %v328_v56 = vmul.f32 %v324_v50, %v318_v53 }
 0x324   :  { %v337_v58 = vadd.f32 %v335_v52, %v327_v55 }
 0x325   :  { %v332_v54 = vpop.permute.xlu1 %331 }
 0x326   :  { %v336_v57 = vmul.f32 %v673_v32, %v332_v54  ;;  %v605_v32 = vld [vmem:[%s852_s6 + $0x3] ss:$0 sm:$0xff] }
 0x328   :  { %v338_v59 = vadd.f32 %v336_v57, %v328_v56 }
 0x32a   :  { %v346_v60 = vpack.c.bf16 %v338_v59, %v337_v58 }
 0x32c   :  { %349 = vrot.lane.b32.xlu0 %v346_v60, %s698_s19 }
 0x39e   :  { %v350_v1 = vpop.permute.xlu0 %349 }
 0x39f   :  { %639 = vmatmul.mubr.msk.bf16.vlgmr.msra.gmra.mrb[4].mxu1 %vm101_vm3, %v350_v1 }
 0x472   :  { %v392_v2 = vpop.f32.mrb[4].mxu1 }
 0x473   :  { %v450_v4 = vadd.f32 %v449_v61, %v392_v2  ;;  %v640_v5 = vpop.f32.mrb[5].mxu1 }
 0x474   :  { %v395_v6 = vpop.f32.mrb[6].mxu1 }
 0x475   :  { %v463_v7 = vadd.f32 %v600_v3, %v450_v4  ;;  %v453_v8 = vadd.f32 %v452_v63, %v395_v6  ;;  %v641_v9 = vpop.f32.mrb[7].mxu1 }
 0x477   :  { %678 = vtanh.f32 %v463_v7  ;;  %v464_v10 = vadd.f32 %v600_v3, %v453_v8  ;;  %v601_v13 = vmul.f32 -1.442695, %v463_v7 }
 0x479   :  { %680 = vtanh.f32 %v464_v10  ;;  %v602_v14 = vmul.f32 -1.442695, %v464_v10 }
 0x47a   :  { %682 = vpow2.f32 %v601_v13 }
 0x47b   :  { %684 = vpow2.f32 %v602_v14 }
 0x481   :  { %v679_v11 = vpop.eup %678 }
 0x482   :  { %483 = vrot.lane.b32.xlu1 %v679_v11, %s700_s7 }
 0x483   :  { %v681_v12 = vpop.eup %680 }
 0x484   :  { %485 = vrot.lane.b32.xlu0 %v681_v12, %s700_s7  ;;  %v683_v15 = vpop.eup %682 }
 0x485   :  { %v685_v16 = vpop.eup %684  ;;  %v471_v17 = vadd.f32 1.0, %v683_v15 }
 0x486   :  { %v472_v18 = vadd.f32 1.0, %v685_v16 }
 0x487   :  { %686 = vrcp.f32 %v471_v17 }
 0x488   :  { %688 = vrcp.f32 %v472_v18 }
 0x491   :  { %v687_v19 = vpop.eup %686 }
 0x492   :  { %v689_v22 = vpop.eup %688  ;;  %v479_v25 = vmul.f32 %v687_v19, %v803_v45 }
 0x493   :  { %v480_v28 = vmul.f32 %v689_v22, %v808_v46 }
 0x4f4   :  { %v484_v20 = vpop.permute.xlu1 %483 }
 0x4f5   :  { %v489_v21 = vmul.f32 %v687_v19, %v484_v20 }
 0x4f6   :  { %v486_v23 = vpop.permute.xlu0 %485 }
 0x4f7   :  { %493 = vrot.lane.b32.xlu1 %v489_v21, %s701_s9  ;;  %v490_v24 = vmul.f32 %v689_v22, %v486_v23 }
 0x4f9   :  { %495 = vrot.lane.b32.xlu0 %v490_v24, %s701_s9 }
 0x569   :  { %v494_v26 = vpop.permute.xlu1 %493 }
 0x56a   :  { %v499_v27 = vadd.f32 %v494_v26, %v479_v25 }
 0x56b   :  { %v496_v29 = vpop.permute.xlu0 %495 }
 0x56c   :  { %690 = vtanh.f32 %v499_v27  ;;  %v500_v30 = vadd.f32 %v496_v29, %v480_v28 }
 0x56e   :  { %692 = vtanh.f32 %v500_v30 }
 0x576   :  { %v691_v31 = vpop.eup %690 }
 0x577   :  { %505 = vrot.lane.b32.xlu1 %v691_v31, %s700_s7 }
 0x578   :  { %v693_v33 = vpop.eup %692 }
 0x579   :  { %507 = vrot.lane.b32.xlu0 %v693_v33, %s700_s7 }
 0x57b   :  { %524 = vrot.lane.b32.xlu1 %v605_v32, %s702_s11 }
 0x5e9   :  { %v506_v34 = vpop.permute.xlu1 %505 }
 0x5ea   :  { %v511_v35 = vmul.f32 %v687_v19, %v506_v34 }
 0x5eb   :  { %v508_v37 = vpop.permute.xlu0 %507 }
 0x5ec   :  { %v517_v36 = vmax.f32 %v511_v35, 0.0  ;;  %v512_v38 = vmul.f32 %v689_v22, %v508_v37 }
 0x5ed   :  { %v525_v39 = vpop.permute.xlu1 %524 }
 0x5ee   :  { %v527_v40 = vmul.f32 %v525_v39, %v517_v36  ;;  %v518_v41 = vmax.f32 %v512_v38, 0.0 }
 0x5f0   :  { %531 = vrot.lane.b32.xlu0 %v527_v40, %s701_s9  ;;  %v528_v42 = vmul.f32 %v525_v39, %v518_v41 }
 0x5f2   :  { %533 = vrot.lane.b32.xlu1 %v528_v42, %s701_s9 }
 0x662   :  { %v532_v43 = vpop.permute.xlu0 %531 }
 0x663   :  { %v537_v44 = vsel %vm411_vm5, %v532_v43, 0.0 }
 0x664   :  { %538 = vadd.xlane.f32.xlu0 %v537_v44  ;;  %v534_v45 = vpop.permute.xlu1 %533 }
 0x665   :  { %v540_v46 = vsel %vm411_vm5, %v534_v45, 0.0 }
 0x666   :  { %541 = vadd.xlane.f32.xlu1 %v540_v46 }
 0x6f1   :  { %v539_v49 = vpop.xlane.xlu0 %538 }
 0x6f2   :  { %v549_v50 = vadd.f32 %v606_v48, %v539_v49 }
 0x6f3   :  { %v542_v51 = vpop.xlane.xlu1 %541 }
 0x6f4   :  { %553 = vperm.xlu0 %660, %v549_v50   ;;  %v550_v52 = vadd.f32 %v606_v48, %v542_v51 }
 0x6f6   :  { %558 = vperm.xlu1 %661, %v550_v52  }
 0x6fa   :  { %563 = vrot.lane.b32.xlu1 %v511_v35, %s701_s9 }
 0x6fe   :  { %565 = vrot.lane.b32.xlu1 %v512_v38, %s701_s9 }
 0x773   :  { %v554_v55 = vpop.permute.xlu0 %553 }
 0x775   :  { %v559_v53 = vpop.permute.xlu1 %558 }
 0x779   :  { %v564_v54 = vpop.permute.xlu1 %563 }
 0x77a   :  { %v569_v56 = vsel %vm411_vm5, %v564_v54, %v499_v27 }
 0x77b   :  { %v572_v57 = vsel %vm571_vm6, %v569_v56, %v554_v55 }
 0x77c   :  { %574 = vst [vmem:[%s856_s8] sm:$0xff] %v572_v57 }
 0x77d   :  { %v566_v58 = vpop.permute.xlu1 %565 }
 0x77e   :  { %v570_v59 = vsel %vm411_vm5, %v566_v58, %v500_v30 }
 0x77f   :  { %v573_v60 = vsel %vm571_vm6, %v570_v59, %v559_v53 }
 0x780   :  { %575 = vst [vmem:[%s856_s8 + $0x8] sm:$0xff] %v573_v60 }

</bundles_post_ra>
